<compile_context>
chip_gen: v6e
topology: v6e:2x2x1
jax: 0.10.0
libtpu: 0.0.40
codegen_flags: <defaults>
</compile_context>

<pallas_src>
import functools

import jax
import jax.numpy as jnp
from jax.experimental import pallas as pl
from jax.experimental.pallas import tpu as pltpu


def _pos_emb_kernel(inv_ref, out_ref, *, klen, clamp_len):
    # inv_ref: (1, half_pad) f32 ; out_ref: (ts, 2 * half_pad) out_dtype.
    ts = out_ref.shape[0]
    half_pad = inv_ref.shape[1]

    # Positions generated in-kernel (no (seq, 1) input stream). For global row
    # g = program_id * ts + r the position is (klen - 1) - g; the (klen - 1)
    # and tile-base terms are folded into ONE scalar so the per-element work
    # is a single int subtract + convert before the multiply.
    c = (klen - 1) - pl.program_id(0) * ts                      # scalar int32
    row = jax.lax.broadcasted_iota(jnp.int32, (ts, half_pad), 0)
    pos = (c - row).astype(jnp.float32)
    if clamp_len is not None:
        pos = jnp.minimum(pos, jnp.float32(clamp_len))          # mem_transformer clamp_len

    inv = inv_ref[...]                                          # hoisted once
    sinusoid = pos * inv                                        # (ts, half_pad) f32

    # NOTE(ragged tile): for the last grid step, rows past klen hold sin/cos
    # of out-of-range (negative) positions; Pallas clips the out-of-bounds
    # rows of this output block on writeback, so they never reach HBM.
    # half_pad % 128 == 0, so both slice stores below are unmasked,
    # lane-dense full-width vst (no concat temp, no vst.msk).
    # TODO(synk): sin and cos share the same argument — a fused shared
    # range-reduction would trim the dominant VPU polynomial chain further.
    out_ref[:, :half_pad] = jnp.sin(sinusoid).astype(out_ref.dtype)
    out_ref[:, half_pad:] = jnp.cos(sinusoid).astype(out_ref.dtype)


def _choose_tile_rows(klen, tile):
    # Sublane-aligned (multiple-of-8) tiles, split into an EVEN number of grid
    # steps so v7x's two TensorCores get balanced work. Tiny klen (< 16) uses
    # a single full-extent tile (a block equal to the full dim is legal even
    # if not a multiple of 8).
    if klen < 16:
        return klen
    n_tiles = max(2, pl.cdiv(klen, tile))
    if n_tiles % 2:
        n_tiles += 1
    ts = pl.cdiv(klen, n_tiles)
    return ((ts + 7) // 8) * 8


def positional_embedding(klen, inv_freq, bsz=None, *, out_dtype=jnp.float32,
                         tile=1024, clamp_len=None):
    """Sinusoidal relative positional embedding (the `r` input of the attn).

    klen:      number of relative positions (positions are klen-1 .. 0).
    inv_freq:  (demb//2,) f32 inverse frequencies (the module's buffer).
    out_dtype: jnp.bfloat16 recommended on v5e (HBM-writeback bound); compute
               stays f32 regardless.
    Returns (klen, 1, demb), or (klen, bsz, demb) if bsz is given (lazy
    broadcast — the kernel itself only ever writes (klen, demb)).
    """
    half = int(inv_freq.shape[0])
    demb = 2 * half

    # Lane-pad the half dim to a multiple of 128 so all stores are unmasked.
    # Pad frequencies are 0 -> sin(0)=0 / cos(0)=1 in the pad columns, which
    # are sliced away below.
    half_pad = max(128, ((half + 127) // 128) * 128)
    inv2d = jnp.pad(inv_freq.astype(jnp.float32),
                    (0, half_pad - half)).reshape(1, half_pad)

    ts = _choose_tile_rows(klen, tile)
    grid = (pl.cdiv(klen, ts),)
    kernel = functools.partial(_pos_emb_kernel, klen=klen, clamp_len=clamp_len)

    out = pl.pallas_call(
        kernel,
        out_shape=jax.ShapeDtypeStruct((klen, 2 * half_pad), out_dtype),
        grid=grid,
        in_specs=[pl.BlockSpec((1, half_pad), lambda i: (0, 0))],
        out_specs=pl.BlockSpec((ts, 2 * half_pad), lambda i: (i, 0)),
        compiler_params=pltpu.CompilerParams(
            dimension_semantics=("parallel",)),
    )(inv2d)

    if half_pad != half:
        # Drop the lane-padding columns (only the small/odd-demb path pads).
        out = jnp.concatenate(
            [out[:, :half], out[:, half_pad:half_pad + half]], axis=-1)

    pos_emb = out[:, None, :]                                   # (klen, 1, demb)
    if bsz is not None:
        # torch .expand(-1, bsz, -1) is a view; mirror it lazily. Consumers
        # that force materialization pay a (klen, bsz, demb) HBM copy.
        pos_emb = jnp.broadcast_to(pos_emb, (klen, bsz, demb))
    return pos_emb


def make_inv_freq(demb):
    # matches: 1 / 10000 ** (arange(0, demb, 2) / demb)
    return 1.0 / (10000.0 ** (jnp.arange(0.0, demb, 2.0, dtype=jnp.float32) / demb))


def reference(pos_seq, inv_freq, bsz=None):
    sinusoid = jnp.outer(pos_seq, inv_freq)
    pos_emb = jnp.concatenate([jnp.sin(sinusoid), jnp.cos(sinusoid)], axis=-1)
    pos_emb = pos_emb[:, None, :]
    if bsz is not None:
        pos_emb = jnp.broadcast_to(pos_emb, (pos_emb.shape[0], bsz, pos_emb.shape[2]))
    return pos_emb


if __name__ == "__main__":
    key = jax.random.PRNGKey(0)   # determinism; positions/freqs are analytic
    del key

    # Small shapes consistent with the module.
    seq, demb, bsz = 8, 32, 2
    inv_freq = make_inv_freq(demb)
    pos_seq = jnp.arange(seq - 1, -1, -1, dtype=jnp.float32)

    out = jax.block_until_ready(positional_embedding(seq, inv_freq))
    assert out.shape == (seq, 1, demb), out.shape
    assert jnp.allclose(out, reference(pos_seq, inv_freq), atol=1e-5, rtol=1e-5)

    # torch-style .expand(bsz) path (lazy broadcast; kernel writes no copies).
    out_b = jax.block_until_ready(positional_embedding(seq, inv_freq, bsz=bsz))
    assert out_b.shape == (seq, bsz, demb)
    assert jnp.allclose(out_b, reference(pos_seq, inv_freq, bsz=bsz), atol=1e-5)

    # Realistic dims: half % 128 == 0 -> no pad columns, even 2-way grid.
    seq2, demb2 = 64, 256
    inv2 = make_inv_freq(demb2)
    pos2 = jnp.arange(seq2 - 1, -1, -1, dtype=jnp.float32)
    out2 = jax.block_until_ready(positional_embedding(seq2, inv2))
    assert out2.shape == (seq2, 1, demb2)
    assert jnp.allclose(out2, reference(pos2, inv2), atol=1e-4, rtol=1e-4)

    # Long sequence: even tiled "parallel" grid with a ragged last block.
    seq3 = 1088
    pos3 = jnp.arange(seq3 - 1, -1, -1, dtype=jnp.float32)
    out3 = jax.block_until_ready(positional_embedding(seq3, inv2, tile=512))
    assert out3.shape == (seq3, 1, demb2)
    assert jnp.allclose(out3, reference(pos3, inv2), atol=1e-2, rtol=1e-3)

    # clamp_len path (mem_transformer clamps relative distance).
    out_c = jax.block_until_ready(positional_embedding(seq3, inv2, clamp_len=512))
    ref_c = reference(jnp.minimum(pos3, 512.0), inv2)
    assert jnp.allclose(out_c, ref_c, atol=1e-2, rtol=1e-3)

    # bf16 output (recommended on v5e: halves HBM writeback; compute stays f32).
    out_bf = jax.block_until_ready(
        positional_embedding(seq, inv_freq, out_dtype=jnp.bfloat16))
    assert out_bf.dtype == jnp.bfloat16
    assert jnp.allclose(out_bf.astype(jnp.float32),
                        reference(pos_seq, inv_freq), atol=2e-2, rtol=2e-2)

    print("KERNEL_OK")
</pallas_src>

<mosaic_0001>
module attributes {stable_mosaic.version = 11 : i64} {
  func.func @_pos_emb_kernel(%arg0: i32, %arg1: memref<1x128xf32, #tpu.memory_space<vmem>>, %arg2: memref<8x256xf32, #tpu.memory_space<vmem>>) attributes {dimension_semantics = [#tpu.dimension_semantics<parallel>], iteration_bounds = array<i64: 1>, scalar_prefetch = 0 : i64, scratch_operands = 0 : i64, tpu.core_type = #tpu.core_type<tc>, window_params = [{pipeline_mode = #tpu.pipeline_mode<synchronous>, transform_indices = @transform_0, window_bounds = array<i64: 1, 128>}, {transform_indices = @transform_1, window_bounds = array<i64: 8, 256>}]} {
    %c8_i32 = arith.constant 8 : i32
    %0 = arith.muli %arg0, %c8_i32 : i32
    %c7_i32 = arith.constant 7 : i32
    %1 = arith.subi %c7_i32, %0 : i32
    %2 = tpu.iota {dimensions = array<i32: 0>} : vector<8x128xi32>
    %3 = vector.broadcast %1 : i32 to vector<8x128xi32>
    %4 = arith.subi %3, %2 : vector<8x128xi32>
    %5 = arith.sitofp %4 : vector<8x128xi32> to vector<8x128xf32>
    %c0 = arith.constant 0 : index
    %c0_0 = arith.constant 0 : index
    %6 = vector.load %arg1[%c0, %c0_0] : memref<1x128xf32, #tpu.memory_space<vmem>>, vector<1x128xf32>
    %7 = vector.broadcast %6 : vector<1x128xf32> to vector<8x128xf32>
    %8 = arith.mulf %5, %7 : vector<8x128xf32>
    %9 = math.sin %8 : vector<8x128xf32>
    %c0_1 = arith.constant 0 : index
    %c0_2 = arith.constant 0 : index
    %10 = vector.load %arg2[%c0_1, %c0_2] : memref<8x256xf32, #tpu.memory_space<vmem>>, vector<8x128xf32>
    tpu.vector_store %arg2[%c0_1, %c0_2], %9 {strides = array<i32>} : memref<8x256xf32, #tpu.memory_space<vmem>>, vector<8x128xf32>,
    %11 = math.cos %8 : vector<8x128xf32>
    %c0_3 = arith.constant 0 : index
    %c128 = arith.constant 128 : index
    %12 = vector.load %arg2[%c0_3, %c128] : memref<8x256xf32, #tpu.memory_space<vmem>>, vector<8x128xf32>
    tpu.vector_store %arg2[%c0_3, %c128], %11 {strides = array<i32>} : memref<8x256xf32, #tpu.memory_space<vmem>>, vector<8x128xf32>,
    return
  }
  func.func @transform_0(%arg0: i32) -> (i32, i32) {
    %c0_i32 = arith.constant 0 : i32
    %c0_i32_0 = arith.constant 0 : i32
    %c0_i32_1 = arith.constant 0 : i32
    return %c0_i32, %c0_i32_0 : i32, i32
  }
  func.func @transform_1(%arg0: i32) -> (i32, i32) {
    %c0_i32 = arith.constant 0 : i32
    %c0_i32_0 = arith.constant 0 : i32
    return %arg0, %c0_i32 : i32, i32
  }
}

</mosaic_0001>

<bundles_post_ra>
// kernel: tpu_custom_call.1
= control target key start
LH: loop header
LB: loop body
LE: loop exit
PB: predicated region body
PF: predicated region fallthrough
CT: control target
= control target key end

     0   :  { %6 = vsyncpa [#allocation3], 0  ;;  %s374_s0 = inlined_call_operand.hbm [shape: f32[1,128], index: 0, kind: input, shape index: {}]   ;;  %s375_s1 = inlined_call_operand.hbm [shape: f32[8,256], index: 1, kind: output, shape index: {}]  }
   0x1   :  { %7 = vsyncpa [#allocation4], 0  ;;  %s329_s6 = smov [#allocation2]  }
   0x2   :  { %s14_s7 = sshll.u32 %s329_s6, 4  ;;  %s15_s7 = int_to_ptr.vmem [resolvable:$true] %s14_s7 }
   0x3   :  { %s293_s8 = scalar_lea.vmem %s15_s7, 16  ;;  %s297_s9 = scalar_lea.vmem %s15_s7, 32 }
   0x4   :  { %p294_p0 = scmp.ne.s32.totalorder %s15_s7, %s293_s8  ;;  %p298_p1 = scmp.lt.s32.totalorder %s15_s7, %s15_s7 }
   0x5   :  { %p299_p2 = scmp.lt.s32.totalorder %s297_s9, %s293_s8 }
   0x7   :  { %p300_p3 = por %p299_p2, %p298_p1 }
   0x9   :  { %p301_p4 = pnand %p300_p3, %p294_p0 }
   0xb   :  { %304 = shalt.err (!%p301_p4)
}
   0xc   :  { %17 = dma.hbm_to_vmem [thread:$0]  %s374_s0, 16, %s15_s7, [#allocation3]  }
   0xd   :  { %325 = dma.done.wait [#allocation3], 16  }
   0xe   :  { %326 = vsyncadd [#allocation3], 4294967280  ;;  %v23_v0 = vlaneseq  ;;  %v260_v4 = vld [vmem:[#allocation2] ss:$0 sm:$0xff]  ;;  %v330_v17 = vmov 683565275  }
   0xf   :  { %v331_v19 = vmov 2475754826   ;;  %v332_v21 = vmov 2131351028   ;;  %v333_v23 = vmov 2102212464  }
  0x10   :  { %v24_v1 = vshrl.u32 %v23_v0, 7  ;;  %v334_v25 = vmov 920167782   ;;  %v335_v32 = vmov 1326507024   ;;  %s336_s0 = smov [#allocation5]  }
  0x11   :  { %s251_s12 = sshll.u32 %s336_s0, 4  ;;  %s252_s12 = int_to_ptr.vmem [resolvable:$true] %s251_s12 }
  0x12   :  { %v26_v2 = vsub.s32 7, %v24_v1  ;;  %s305_s13 = scalar_lea.vmem %s252_s12, 256  ;;  %p310_p6 = scmp.lt.s32.totalorder %s252_s12, %s252_s12 }
  0x13   :  { %p306_p5 = scmp.ne.s32.totalorder %s252_s12, %s305_s13  ;;  %p311_p7 = scmp.lt.s32.totalorder %s305_s13, %s305_s13 }
  0x14   :  { %v27_v3 = vcvt.s32.f32 %v26_v2 }
  0x15   :  { %p312_p8 = por %p311_p7, %p310_p6 }
  0x16   :  { %v350_v5 = vmul.f32 %v260_v4, %v27_v3 }
  0x17   :  { %p313_p9 = pnand %p312_p8, %p306_p5 }
  0x18   :  { %v39_v6 = vand.u32 2139095040, %v350_v5  ;;  %v36_v8 = vand.u32 2147483647, %v350_v5  ;;  %vm38_vm7 = vcmp.lt.s32.totalorder %v350_v5, 0  ;;  %vm128_vm15 = vweird.f32 %v350_v5 }
  0x1a   :  { %v40_v7 = vshrl.u32 %v39_v6, 23  ;;  %v43_v11 = vand.u32 8388607, %v36_v8  ;;  %vm37_vm8 = vcmp.le.f32.partialorder %v36_v8, 0.7853982 }
  0x1c   :  { %v261_v9 = vadd.s32 4294967169, %v40_v7  ;;  %v44_v14 = vor.u32 8388608, %v43_v11 }
  0x1e   :  { %v46_v10 = vadd.s32 1, %v261_v9  ;;  %v84_v34 = vshll.u32 %v44_v14, 8 }
  0x20   :  { %vm47_vm0 = vcmp.gt.s32.totalorder %v46_v10, 0 }
  0x21   :  { %v48_v12 = vsel %vm47_vm0, %v46_v10, 0 }
  0x22   :  { %v50_v13 = vand.u32 31, %v48_v12  ;;  %v49_v15 = vshrl.u32 %v48_v12, 5 }
  0x24   :  { %v51_v16 = vsub.s32 32, %v50_v13  ;;  %v53_v18 = vshll.u32 %v330_v17, %v50_v13  ;;  %v56_v20 = vshll.u32 %v331_v19, %v50_v13  ;;  %v59_v22 = vshll.u32 %v332_v21, %v50_v13 }
  0x25   :  { %v62_v24 = vshll.u32 %v333_v23, %v50_v13  ;;  %v65_v26 = vshll.u32 %v334_v25, %v50_v13  ;;  %vm68_vm1 = vcmp.lt.s32.totalorder %v49_v15, 1  ;;  %vm71_vm2 = vcmp.lt.s32.totalorder %v49_v15, 4 }
  0x26   :  { %v52_v27 = vshrl.u32 %v330_v17, %v51_v16  ;;  %v54_v28 = vshrl.u32 %v331_v19, %v51_v16  ;;  %v57_v29 = vshrl.u32 %v332_v21, %v51_v16  ;;  %v60_v30 = vshrl.u32 %v333_v23, %v51_v16 }
  0x27   :  { %v63_v31 = vshrl.u32 %v334_v25, %v51_v16  ;;  %v66_v33 = vshrl.u32 %v335_v32, %v51_v16  ;;  %vm69_vm3 = vcmp.lt.s32.totalorder %v49_v15, 2  ;;  %vm70_vm4 = vcmp.lt.s32.totalorder %v49_v15, 3 }
  0x28   :  { %v55_v35 = vor.u32 %v54_v28, %v53_v18  ;;  %v58_v36 = vor.u32 %v57_v29, %v56_v20  ;;  %v61_v37 = vor.u32 %v60_v30, %v59_v22 }
  0x29   :  { %v64_v38 = vor.u32 %v63_v31, %v62_v24  ;;  %v67_v39 = vor.u32 %v66_v33, %v65_v26 }
  0x2a   :  { %v72_v40 = vsel %vm68_vm1, %v52_v27, %v55_v35  ;;  %v73_v41 = vsel %vm71_vm2, %v61_v37, 2102212464  ;;  %v76_v42 = vsel %vm68_vm1, %v55_v35, %v58_v36  ;;  %v80_v43 = vsel %vm68_vm1, %v58_v36, %v61_v37 }
  0x2b   :  { %v74_v44 = vsel %vm70_vm4, %v58_v36, %v73_v41  ;;  %v77_v45 = vsel %vm71_vm2, %v64_v38, 920167782  ;;  %v81_v46 = vsel %vm71_vm2, %v67_v39, 1326507024 }
  0x2c   :  { %v78_v47 = vsel %vm70_vm4, %v61_v37, %v77_v45  ;;  %v82_v48 = vsel %vm70_vm4, %v64_v38, %v81_v46  ;;  %v75_v49 = vsel %vm69_vm3, %v72_v40, %v74_v44 }
  0x2d   :  { %v79_v50 = vsel %vm69_vm3, %v76_v42, %v78_v47  ;;  %v83_v51 = vsel %vm69_vm3, %v80_v43, %v82_v48  ;;  %v91_v56 = vmul.u32 %v84_v34, %v75_v49 }
  0x2e   :  { %v356_v52 = vmul.u32.u64.low %v84_v34, %v83_v51  ;;  %v357_v53 = vmul.u32.u64.high %v84_v34, %v83_v51, %v356_v52  ;;  %v359_v54 = vmul.u32.u64.low %v84_v34, %v79_v50  ;;  %v360_v55 = vmul.u32.u64.high %v84_v34, %v79_v50, %v359_v54 }
  0x30   :  { %vm93_vm5 = vc.u32 %v357_v53, %v359_v54  ;;  %v94_v57 = vadd.s32 1, %v360_v55  ;;  %v92_v4 = vadd.s32 %v359_v54, %v357_v53 }
  0x32   :  { %v95_v58 = vsel %vm93_vm5, %v94_v57, %v360_v55 }
  0x33   :  { %v96_v59 = vadd.s32 %v95_v58, %v91_v56 }
  0x35   :  { %v97_v60 = vadd.s32 536870912, %v96_v59 }
  0x37   :  { %v98_v61 = vshrl.u32 %v97_v60, 30 }
  0x39   :  { %v99_v62 = vshll.u32 %v98_v61, 30  ;;  %v122_v19 = vsub.s32 4, %v98_v61 }
  0x3b   :  { %v100_v63 = vsub.s32 %v96_v59, %v99_v62  ;;  %v123_v22 = vsel %vm38_vm7, %v122_v19, %v98_v61 }
  0x3c   :  { %v125_v24 = vsel %vm37_vm8, 0, %v123_v22 }
  0x3d   :  { %v102_v0 = vsub.s32 0, %v100_v63  ;;  %v129_v25 = vadd.s32 3, %v125_v24  ;;  %v234_v27 = vand.u32 3, %v125_v24 }
  0x3f   :  { %v262_v1 = vmin.u32 %v102_v0, %v100_v63  ;;  %v130_v26 = vand.u32 3, %v129_v25  ;;  %vm239_vm10 = vcmp.eq.s32.totalorder %v234_v27, 2  ;;  %vm236_vm12 = vcmp.eq.s32.totalorder %v234_v27, 0 }
  0x40   :  { %vm235_vm14 = vcmp.lt.s32.totalorder %v234_v27, 2 }
  0x41   :  { %v104_v2 = vclz %v262_v1  ;;  %vm135_vm9 = vcmp.eq.s32.totalorder %v130_v26, 2  ;;  %vm132_vm11 = vcmp.eq.s32.totalorder %v130_v26, 0  ;;  %vm131_vm13 = vcmp.lt.s32.totalorder %v130_v26, 2 }
  0x43   :  { %v263_v3 = vadd.s32 4294967294, %v104_v2 }
  0x45   :  { %vm264_vm6 = vcmp.lt.s32.totalorder %v263_v3, 0 }
  0x46   :  { %v107_v6 = vsel %vm264_vm6, 0, %v263_v3 }
  0x47   :  { %v108_v7 = vsub.s32 32, %v107_v6  ;;  %v109_v9 = vshll.u32 %v100_v63, %v107_v6  ;;  %v112_v10 = vsub.s32 4294967266, %v107_v6 }
  0x49   :  { %v110_v11 = vshrl.u32 %v92_v4, %v108_v7  ;;  %v113_v12 = vadd.s32 127, %v112_v10 }
  0x4b   :  { %v111_v13 = vor.u32 %v110_v11, %v109_v9  ;;  %v114_v14 = vshll.u32 %v113_v12, 23 }
  0x4d   :  { %v115_v15 = vor.u32 4788187, %v114_v14  ;;  %v118_v16 = vcvt.s32.f32 %v111_v13 }
  0x4f   :  { %v116_v17 = vand.u32 2147483647, %v115_v15 }
  0x51   :  { %v119_v18 = vmul.f32 %v118_v16, %v116_v17 }
  0x53   :  { %v120_v20 = vxor.u32 2147483648, %v119_v18 }
  0x55   :  { %v121_v21 = vsel %vm38_vm7, %v120_v20, %v119_v18 }
  0x56   :  { %v124_v23 = vsel %vm37_vm8, %v350_v5, %v121_v21 }
  0x57   :  { %281 = vcosq.f32 %v124_v23 }
  0x58   :  { %283 = vsinq.f32 %v124_v23 }
  0x64   :  { %v282_v28 = vpop.eup %281 }
  0x65   :  { %v284_v29 = vpop.eup %283  ;;  %v136_v30 = vxor.u32 2147483648, %v282_v28 }
  0x66   :  { %v133_v8 = vxor.u32 2147483648, %v284_v29 }
  0x67   :  { %v137_v31 = vsel %vm135_vm9, %v136_v30, %v284_v29  ;;  %v241_v32 = vsel %vm239_vm10, %v136_v30, %v284_v29 }
  0x68   :  { %v134_v33 = vsel %vm132_vm11, %v282_v28, %v133_v8  ;;  %v238_v34 = vsel %vm236_vm12, %v282_v28, %v133_v8 }
  0x69   :  { %v138_v35 = vsel %vm131_vm13, %v134_v33, %v137_v31  ;;  %v242_v36 = vsel %vm235_vm14, %v238_v34, %v241_v32 }
  0x6a   :  { %v139_v37 = vsel %vm128_vm15, nan, %v138_v35  ;;  %v243_v38 = vsel %vm128_vm15, nan, %v242_v36 }
  0x6b   :  { %140 = vst [vmem:[#allocation5] sm:$0xff] %v139_v37  ;;  %244 = vst [vmem:[#allocation5 + $0x8] sm:$0xff] %v243_v38 }
  0x6c   :  { %316 = shalt.err (!%p313_p9)
}
  0x6d   :  { %254 = dma.vmem_to_hbm [thread:$0]  %s252_s12, 256, %s375_s1, [#allocation4]  }
  0x6e   :  { %327 = dma.done.wait [#allocation4], 256  }
  0x6f   :  { %328 = vsyncadd [#allocation4], 4294967040 }
  0x70   :  { %258 = vsyncpa [#allocation3], 1 }
  0x71   :  { %259 = vsyncpa [#allocation4], 1 }

</bundles_post_ra>
